<compile_context>
chip_gen: v5e
topology: v5e:2x2
jax: 0.10.0
libtpu: 0.0.40
codegen_flags: <defaults>
</compile_context>

<pallas_src>
import jax
import jax.numpy as jnp
from jax.experimental import pallas as pl
from jax.experimental.pallas import tpu as pltpu


# ----------------------------- tiling policy --------------------------------

_TM_MAX = 512    # batch-tile cap (multiple of 256 and 8)
_TN_MAX = 512    # output-feature tile cap (multiple of 256 and 128)
_TK_MAX = 2048   # contraction tile cap; full-K resident when in_features <= this
_VMEM_LIMIT = 48 * 1024 * 1024


def _round_up(v, m):
    return ((v + m - 1) // m) * m


def _m_tiling(n):
    """Batch axis: sublane (8) alignment only; tile at _TM_MAX for big batches."""
    if n <= _TM_MAX:
        tm = _round_up(n, 8)
        return tm, tm            # (padded M, tile M) -> single M block
    return _round_up(n, _TM_MAX), _TM_MAX


def _n_tiling(out_f):
    """Output-feature axis: lane (128) alignment for unmasked stores."""
    if out_f <= _TN_MAX:
        tn = _round_up(out_f, 128)
        return tn, tn
    return _round_up(out_f, _TN_MAX), _TN_MAX


def _k_tiling(in_f):
    """Contraction axis: keep fully resident in VMEM when it fits."""
    if in_f <= _TK_MAX:
        kp = _round_up(in_f, 128)
        return kp, kp, False     # (padded K, tile K, k_tiled?)
    return _round_up(in_f, _TK_MAX), _TK_MAX, True


# ------------------------------- kernels ------------------------------------

def _linear_kernel(x_ref, w_ref, b_ref, o_ref):
    # Full-K resident path: x (tm, Kp) . w (Kp, tn) + b (1, tn) -> o (tm, tn).
    # No reduction axis, no scratch, bias fused into the single store.
    o_ref[...] = (
        jnp.dot(x_ref[...], w_ref[...], preferred_element_type=jnp.float32)
        + b_ref[...]
    ).astype(o_ref.dtype)


def _linear_ktiled_kernel(x_ref, w_ref, b_ref, o_ref):
    # K-tiled path: accumulate directly into the f32 output block, which stays
    # resident across the (last, "arbitrary") K grid axis.
    k = pl.program_id(2)

    @pl.when(k == 0)
    def _():
        o_ref[...] = jnp.zeros_like(o_ref)

    o_ref[...] += jnp.dot(x_ref[...], w_ref[...],
                          preferred_element_type=jnp.float32)

    @pl.when(k == pl.num_programs(2) - 1)
    def _():
        o_ref[...] = o_ref[...] + b_ref[...]


# ------------------------------- wrappers ------------------------------------

def prepare_linear_params(weight, bias):
    """One-time layout of nn.Linear parameters (hoisted out of the forward).

    weight: (out_features, in_features)  -> (Kp, Np) padded, transposed
    bias:   (out_features,)              -> (1, Np) padded
    """
    out_f, in_f = weight.shape
    kp, _, _ = _k_tiling(in_f)
    np_, _ = _n_tiling(out_f)
    w_kn = jnp.pad(weight.T, ((0, kp - in_f), (0, np_ - out_f)))
    b_row = jnp.pad(bias, (0, np_ - out_f)).reshape(1, np_)
    return w_kn, b_row


def linear_forward_prepared(x, w_kn, b_row, out_features):
    """y = x @ W.T + b with pre-laid-out parameters from prepare_linear_params."""
    n, in_f = x.shape
    kp, tk, k_tiled = _k_tiling(in_f)
    np_, tn = _n_tiling(out_features)
    mp, tm = _m_tiling(n)
    assert w_kn.shape == (kp, np_), "weight was prepared for different sizes"
    assert b_row.shape == (1, np_)

    # Only the activation may need per-call padding (zero pad is exact).
    if mp == n and kp == in_f:
        x_p = x
    else:
        x_p = jnp.pad(x, ((0, mp - n), (0, kp - in_f)))

    if not k_tiled:
        # Common linear-layer case: K fully resident, 2-D parallel grid
        # (a single grid point for small problems).
        out_p = pl.pallas_call(
            _linear_kernel,
            out_shape=jax.ShapeDtypeStruct((mp, np_), x.dtype),
            grid=(mp // tm, np_ // tn),
            in_specs=[
                pl.BlockSpec((tm, kp), lambda i, j: (i, 0)),   # x
                pl.BlockSpec((kp, tn), lambda i, j: (0, j)),   # weight (K, N)
                pl.BlockSpec((1, tn), lambda i, j: (0, j)),    # bias
            ],
            out_specs=pl.BlockSpec((tm, tn), lambda i, j: (i, j)),
            compiler_params=pltpu.CompilerParams(
                dimension_semantics=("parallel", "parallel"),
                vmem_limit_bytes=_VMEM_LIMIT,
            ),
        )(x_p, w_kn, b_row)
    else:
        # Large in_features: 3-D grid, reduction axis last, accumulate in-place
        # into the resident f32 output block.
        out_p = pl.pallas_call(
            _linear_ktiled_kernel,
            out_shape=jax.ShapeDtypeStruct((mp, np_), jnp.float32),
            grid=(mp // tm, np_ // tn, kp // tk),
            in_specs=[
                pl.BlockSpec((tm, tk), lambda i, j, k: (i, k)),   # x
                pl.BlockSpec((tk, tn), lambda i, j, k: (k, j)),   # weight (K, N)
                pl.BlockSpec((1, tn), lambda i, j, k: (0, j)),    # bias
            ],
            out_specs=pl.BlockSpec((tm, tn), lambda i, j, k: (i, j)),
            compiler_params=pltpu.CompilerParams(
                dimension_semantics=("parallel", "parallel", "arbitrary"),
                vmem_limit_bytes=_VMEM_LIMIT,
            ),
        )(x_p, w_kn, b_row).astype(x.dtype)

    return out_p[:n, :out_features]


def linear_forward(x, weight, bias):
    """Convenience one-shot call (parameter prep NOT amortized across calls)."""
    w_kn, b_row = prepare_linear_params(weight, bias)
    return linear_forward_prepared(x, w_kn, b_row, weight.shape[0])


# --------------------------------- tests -------------------------------------

if __name__ == "__main__":
    key = jax.random.PRNGKey(0)

    # --- Case 1: the module's default nn.Linear(1, 1), batch 8 --------------
    k1, k2, k3, key = jax.random.split(key, 4)
    x = jax.random.normal(k1, (8, 1), jnp.float32)
    w = jax.random.uniform(k2, (1, 1), jnp.float32, minval=-1.0, maxval=1.0)
    b = jax.random.uniform(k3, (1,), jnp.float32, minval=-1.0, maxval=1.0)

    w_kn, b_row = prepare_linear_params(w, b)          # hoisted param prep
    y = linear_forward_prepared(x, w_kn, b_row, 1)
    jax.block_until_ready(y)
    y_ref = x @ w.T + b
    assert y.shape == (8, 1)
    assert jnp.allclose(y, y_ref, atol=1e-5, rtol=1e-5)

    # --- Case 2: small lane-dense layer, single-block resident-K path -------
    k1, k2, k3, key = jax.random.split(key, 4)
    x2 = jax.random.normal(k1, (32, 384), jnp.float32)
    w2 = jax.random.normal(k2, (256, 384), jnp.float32) * 0.05
    b2 = jax.random.normal(k3, (256,), jnp.float32)
    y2 = linear_forward(x2, w2, b2)
    jax.block_until_ready(y2)
    assert y2.shape == (32, 256)
    assert jnp.allclose(y2, x2 @ w2.T + b2, atol=1e-3, rtol=1e-3)

    # --- Case 3: large in_features exercises the K-tiled reduction path -----
    k1, k2, k3, key = jax.random.split(key, 4)
    x3 = jax.random.normal(k1, (16, 4096), jnp.float32) * 0.05
    w3 = jax.random.normal(k2, (128, 4096), jnp.float32) * 0.05
    b3 = jax.random.normal(k3, (128,), jnp.float32)
    y3 = linear_forward(x3, w3, b3)
    jax.block_until_ready(y3)
    assert y3.shape == (16, 128)
    assert jnp.allclose(y3, x3 @ w3.T + b3, atol=1e-3, rtol=1e-3)

    print("KERNEL_OK")
</pallas_src>

<mosaic_0001>
module attributes {stable_mosaic.version = 11 : i64} {
  func.func @_linear_kernel(%arg0: i32, %arg1: i32, %arg2: memref<8x128xf32, #tpu.memory_space<vmem>>, %arg3: memref<128x128xf32, #tpu.memory_space<vmem>>, %arg4: memref<1x128xf32, #tpu.memory_space<vmem>>, %arg5: memref<8x128xf32, #tpu.memory_space<vmem>>) attributes {dimension_semantics = [#tpu.dimension_semantics<parallel>, #tpu.dimension_semantics<parallel>], iteration_bounds = array<i64: 1, 1>, scalar_prefetch = 0 : i64, scratch_operands = 0 : i64, tpu.core_type = #tpu.core_type<tc>, window_params = [{transform_indices = @transform_0, window_bounds = array<i64: 8, 128>}, {transform_indices = @transform_1, window_bounds = array<i64: 128, 128>}, {transform_indices = @transform_2, window_bounds = array<i64: 1, 128>}, {transform_indices = @transform_3, window_bounds = array<i64: 8, 128>}]} {
    %c0 = arith.constant 0 : index
    %c0_0 = arith.constant 0 : index
    %0 = vector.load %arg2[%c0, %c0_0] : memref<8x128xf32, #tpu.memory_space<vmem>>, vector<8x128xf32>
    %c0_1 = arith.constant 0 : index
    %c0_2 = arith.constant 0 : index
    %1 = vector.load %arg3[%c0_1, %c0_2] : memref<128x128xf32, #tpu.memory_space<vmem>>, vector<128x128xf32>
    %cst = arith.constant dense<0.000000e+00> : vector<8x128xf32>
    %2 = tpu.matmul %0, %1, %cst {dimension_numbers = #tpu.dot_dimension_numbers<[1], [0], [0], [1], [0, 0, 1, 1], [], []>} : vector<8x128xf32>, vector<128x128xf32>, vector<8x128xf32> -> vector<8x128xf32>
    %c0_3 = arith.constant 0 : index
    %c0_4 = arith.constant 0 : index
    %3 = vector.load %arg4[%c0_3, %c0_4] : memref<1x128xf32, #tpu.memory_space<vmem>>, vector<1x128xf32>
    %4 = vector.broadcast %3 : vector<1x128xf32> to vector<8x128xf32>
    %5 = arith.addf %2, %4 : vector<8x128xf32>
    %c0_5 = arith.constant 0 : index
    %c0_6 = arith.constant 0 : index
    %6 = vector.load %arg5[%c0_5, %c0_6] : memref<8x128xf32, #tpu.memory_space<vmem>>, vector<8x128xf32>
    tpu.vector_store %arg5[%c0_5, %c0_6], %5 {strides = array<i32>} : memref<8x128xf32, #tpu.memory_space<vmem>>, vector<8x128xf32>,
    return
  }
  func.func @transform_0(%arg0: i32, %arg1: i32) -> (i32, i32) {
    %c0_i32 = arith.constant 0 : i32
    %c0_i32_0 = arith.constant 0 : i32
    return %arg0, %c0_i32 : i32, i32
  }
  func.func @transform_1(%arg0: i32, %arg1: i32) -> (i32, i32) {
    %c0_i32 = arith.constant 0 : i32
    %c0_i32_0 = arith.constant 0 : i32
    return %c0_i32, %arg1 : i32, i32
  }
  func.func @transform_2(%arg0: i32, %arg1: i32) -> (i32, i32) {
    %c0_i32 = arith.constant 0 : i32
    %c0_i32_0 = arith.constant 0 : i32
    return %c0_i32, %arg1 : i32, i32
  }
  func.func @transform_3(%arg0: i32, %arg1: i32) -> (i32, i32) {
    %c0_i32 = arith.constant 0 : i32
    return %arg0, %arg1 : i32, i32
  }
}

</mosaic_0001>

<bundles_post_ra>
// kernel: tpu_custom_call.1
= control target key start
LH: loop header
LB: loop body
LE: loop exit
PB: predicated region body
PF: predicated region fallthrough
CT: control target
= control target key end

     0   :  { %8 = vsyncpa [#allocation3], 0  ;;  %s226_s0 = inlined_call_operand.hbm [shape: f32[8,128], index: 0, kind: input, shape index: {}]   ;;  %s227_s1 = inlined_call_operand.hbm [shape: f32[128,128], index: 1, kind: input, shape index: {}]   ;;  %s228_s2 = inlined_call_operand.vmem [shape: f32[1,128], index: 2, kind: input, shape index: {}]   ;;  %s229_s3 = inlined_call_operand.hbm [shape: f32[8,128], index: 3, kind: output, shape index: {}]  }
   0x1   :  { %9 = vsyncpa [#allocation6], 0 }
   0x2   :  { %10 = vsyncpa [#allocation4], 0  ;;  %s16_s14 = sshll.u32 %s226_s0, 4  ;;  %s189_s15 = smov [#allocation2]   ;;  %s17_s14 = int_to_ptr.hbm [resolvable:$true] %s16_s14 }
   0x3   :  { %s18_s16 = sshll.u32 %s189_s15, 4  ;;  %s26_s19 = sshll.u32 %s227_s1, 4  ;;  %s19_s16 = int_to_ptr.vmem [resolvable:$true] %s18_s16  ;;  %s27_s19 = int_to_ptr.hbm [resolvable:$true] %s26_s19 }
   0x4   :  { %21 = dma.hbm_to_vmem [thread:$0]  %s17_s14, 128, %s19_s16, [#allocation3]  }
   0x5   :  { %s190_s20 = smov [#allocation5]   ;;  %s191_s22 = smov 128  }
   0x6   :  { %s28_s21 = sshll.u32 %s190_s20, 4  ;;  %s192_s23 = smov 8   ;;  %s29_s21 = int_to_ptr.vmem [resolvable:$true] %s28_s21 }
   0x7   :  { %34 = dma.hbm_to_vmem [thread:$0]  %s27_s19, 2048, %s29_s21, [#allocation6], %s191_s22, %s191_s22, %s192_s23  }
   0x8   :  { %183 = dma.done.wait [#allocation3], 128  }
   0x9   :  { %184 = vsyncadd [#allocation3], 4294967168 }
   0xa   :  { %185 = dma.done.wait [#allocation6], 2048  }
   0xb   :  { %186 = vsyncadd [#allocation6], 4294965248  ;;  %v61_v0 = vld [vmem:[#allocation5 + $0x78] sm:$0xff]  ;;  %v60_v1 = vld [vmem:[#allocation5 + $0x70] sm:$0xff]  ;;  %s193_s24 = smov [#allocation7]   ;;  %s94_s28 = sshll.u32 %s229_s3, 4  ;;  %s95_s28 = int_to_ptr.hbm [resolvable:$true] %s94_s28 }
   0xc   :  { %66 = vmatpush.msra.mxu0 %v61_v0  ;;  %v59_v2 = vld [vmem:[#allocation5 + $0x68] sm:$0xff]  ;;  %v58_v3 = vld [vmem:[#allocation5 + $0x60] sm:$0xff]  ;;  %v57_v4 = vld [vmem:[#allocation5 + $0x58] sm:$0xff]  ;;  %s92_s25 = sshll.u32 %s193_s24, 4  ;;  %s93_s25 = int_to_ptr.vmem [resolvable:$true] %s92_s25 }
   0xd   :  { %v56_v5 = vld [vmem:[#allocation5 + $0x50] sm:$0xff]  ;;  %v55_v6 = vld [vmem:[#allocation5 + $0x48] sm:$0xff]  ;;  %v54_v7 = vld [vmem:[#allocation5 + $0x40] sm:$0xff] }
   0xe   :  { %67 = vmatpush.msra.mxu0 %v60_v1  ;;  %v53_v8 = vld [vmem:[#allocation5 + $0x38] sm:$0xff]  ;;  %v52_v9 = vld [vmem:[#allocation5 + $0x30] sm:$0xff]  ;;  %v51_v10 = vld [vmem:[#allocation5 + $0x28] sm:$0xff] }
   0xf   :  { %v50_v11 = vld [vmem:[#allocation5 + $0x20] sm:$0xff]  ;;  %v49_v12 = vld [vmem:[#allocation5 + $0x18] sm:$0xff]  ;;  %v48_v13 = vld [vmem:[#allocation5 + $0x10] sm:$0xff] }
  0x10   :  { %68 = vmatpush.msra.mxu0 %v59_v2  ;;  %v47_v14 = vld [vmem:[#allocation5 + $0x8] sm:$0xff]  ;;  %v46_v15 = vld [vmem:[#allocation5] sm:$0xff]  ;;  %v45_v16 = vld [vmem:[#allocation2] sm:$0xff] }
  0x11   :  { %v110_v17 = vld [vmem:[%s228_s2] ss:$0 sm:$0xff] }
  0x12   :  { %69 = vmatpush.msra.mxu0 %v58_v3 }
  0x14   :  { %70 = vmatpush.msra.mxu0 %v57_v4 }
  0x16   :  { %71 = vmatpush.msra.mxu0 %v56_v5 }
  0x18   :  { %72 = vmatpush.msra.mxu0 %v55_v6 }
  0x1a   :  { %73 = vmatpush.msra.mxu0 %v54_v7 }
  0x1c   :  { %74 = vmatpush.msra.mxu0 %v53_v8 }
  0x1e   :  { %75 = vmatpush.msra.mxu0 %v52_v9 }
  0x20   :  { %76 = vmatpush.msra.mxu0 %v51_v10 }
  0x22   :  { %77 = vmatpush.msra.mxu0 %v50_v11 }
  0x24   :  { %78 = vmatpush.msra.mxu0 %v49_v12 }
  0x26   :  { %79 = vmatpush.msra.mxu0 %v48_v13 }
  0x28   :  { %80 = vmatpush.msra.mxu0 %v47_v14 }
  0x2a   :  { %81 = vmatpush.msra.mxu0 %v46_v15 }
  0x2b   :  { %82 = vmatmul.f32.vlgmr.msra.gmra.mxu0 %v45_v16 }
  0xa8   :  { %v83_v18 = vpop.f32.mrf.mxu0 }
  0xa9   :  { %v84_v19 = vadd.f32 %v110_v17, %v83_v18 }
  0xab   :  { %86 = vst [vmem:[#allocation7] sm:$0xff] %v84_v19 }
  0xac   :  { %97 = dma.vmem_to_hbm [thread:$0]  %s93_s25, 128, %s95_s28, [#allocation4]  }
  0xad   :  { %187 = dma.done.wait [#allocation4], 128  }
  0xae   :  { %188 = vsyncadd [#allocation4], 4294967168 }
  0xaf   :  { %102 = vsyncpa [#allocation3], 1 }
  0xb0   :  { %103 = vsyncpa [#allocation6], 1 }
  0xb1   :  { %104 = vsyncpa [#allocation4], 1 }

</bundles_post_ra>
